<compile_context>
chip_gen: v7x
topology: tpu7x:2x2x1
jax: 0.10.0
libtpu: 0.0.40
codegen_flags: <defaults>
</compile_context>

<pallas_src>
import functools

import numpy as np
import jax
import jax.numpy as jnp
from jax.experimental import pallas as pl
from jax.experimental.pallas import tpu as pltpu


_VMEM_LIMIT = 32 * 1024 * 1024  # explicit scoped-VMEM budget (safe on v5e/v6e/v7x)


def _round_up(x, m):
    return ((x + m - 1) // m) * m


def _pick_tile(n, target):
    """Column (row-count) tile: multiple of 128 lanes, capped at `target`."""
    return min(_round_up(max(n, 1), 128), _round_up(max(target, 128), 128))


# ---------------------------------------------------------------------------
# Batched clause-enhancer math (transposed / lane-dense layout).
#   sel  : [C*K, T]  signed selected literals  (G @ x_t)
#   mask : [C*K, 1]  1.0 for real literal rows, 0.0 for padding rows
#   w    : [C*K, 1]  clause weight replicated on that clause's literal rows
#   seg  : [C*K,C*K] same-clause indicator  (kron(I_C, ones(K,K)))
# Returns d : [C*K, T] with d = weight * softmax_within_clause(sel), so that
# delta = G^T @ d reproduces KENN's per-clause softmax * weight * sign scatter.
# ---------------------------------------------------------------------------
def _clause_deltas_t(sel, mask, w, seg, n_clauses, lits):
    f32 = jnp.float32
    t = sel.shape[-1]
    neg = jnp.float32(-1e30)
    sel_m = jnp.where(mask > 0, sel, neg)

    # Per-clause (segment) max — static loop over clauses (C is a compile-time
    # constant, small).  Fixes the underflow issue of a row/column-wide max.
    parts = []
    for c in range(n_clauses):
        mc = jnp.max(sel_m[c * lits:(c + 1) * lits, :], axis=0, keepdims=True)  # [1, T]
        parts.append(jnp.broadcast_to(mc, (lits, t)))
    mx = parts[0] if n_clauses == 1 else jnp.concatenate(parts, axis=0)          # [CK, T]

    e = jnp.exp(sel_m - mx) * mask                                   # masked exp
    seg_sum = jnp.dot(seg, e, preferred_element_type=f32)            # per-clause sums
    sm = e / (seg_sum + jnp.float32(1e-30))                          # exact softmax
    return sm * w


# ---------------------------------------------------------------------------
# Kernel 1: unary KnowledgeEnhancer.  Tiles: [NU, tn] with objects on lanes.
# ---------------------------------------------------------------------------
def _unary_ke_kernel(x_ref, g_ref, gt_ref, m_ref, w_ref, seg_ref, o_ref,
                     *, n_clauses, lits):
    f32 = jnp.float32
    x = x_ref[...]                                                   # [NU, T]
    sel = jnp.dot(g_ref[...], x, preferred_element_type=f32)         # [CK, T]
    d = _clause_deltas_t(sel, m_ref[...], w_ref[...], seg_ref[...], n_clauses, lits)
    delta = jnp.dot(gt_ref[...], d, preferred_element_type=f32)      # [NU, T] = G^T @ d
    o_ref[...] = x + delta


def _unary_stage(ut, params, tn):
    f32 = jnp.float32
    NU, Np = ut.shape
    g = params["G"]
    CK = g.shape[0]
    gt = g.T                                                         # tiny, host-side
    kern = functools.partial(_unary_ke_kernel,
                             n_clauses=params["n_clauses"], lits=params["max_lits"])
    const = lambda i: (0, 0)
    return pl.pallas_call(
        kern,
        out_shape=jax.ShapeDtypeStruct((NU, Np), f32),
        grid=(Np // tn,),
        in_specs=[
            pl.BlockSpec((NU, tn), lambda i: (0, i)),                # unary^T tile
            pl.BlockSpec((CK, NU), const),                           # G
            pl.BlockSpec((NU, CK), const),                           # G^T
            pl.BlockSpec((CK, 1), const),                            # literal mask
            pl.BlockSpec((CK, 1), const),                            # clause weights
            pl.BlockSpec((CK, CK), const),                           # same-clause matrix
        ],
        out_specs=pl.BlockSpec((NU, tn), lambda i: (0, i)),
        compiler_params=pltpu.CompilerParams(
            dimension_semantics=("parallel",),
            vmem_limit_bytes=_VMEM_LIMIT),
    )(ut, g, gt, params["mask"], params["w"], params["seg"])


# ---------------------------------------------------------------------------
# Kernel 2: binary KnowledgeEnhancer on joined = [u1 | u2 | binary] (never
# materialized: sel is the sum of three small matmuls).  Tiles: [*, tm] with
# object-pairs on lanes.  Outputs the per-pair unary deltas (ux, uy) and the
# enhanced binary tile — fully independent per tile ("parallel" grid).
# ---------------------------------------------------------------------------
def _binary_ke_kernel(u1_ref, u2_ref, b_ref,
                      gx_ref, gy_ref, gb_ref,
                      gxt_ref, gyt_ref, gbt_ref,
                      m_ref, w_ref, seg_ref,
                      ux_ref, uy_ref, ob_ref,
                      *, n_clauses, lits):
    f32 = jnp.float32
    u1 = u1_ref[...]                                                 # [NU, T]
    u2 = u2_ref[...]                                                 # [NU, T]
    b = b_ref[...]                                                   # [NB, T]
    sel = (jnp.dot(gx_ref[...], u1, preferred_element_type=f32)
           + jnp.dot(gy_ref[...], u2, preferred_element_type=f32)
           + jnp.dot(gb_ref[...], b, preferred_element_type=f32))    # [CK, T]
    d = _clause_deltas_t(sel, m_ref[...], w_ref[...], seg_ref[...], n_clauses, lits)
    ux_ref[...] = jnp.dot(gxt_ref[...], d, preferred_element_type=f32)   # deltas obj 1
    uy_ref[...] = jnp.dot(gyt_ref[...], d, preferred_element_type=f32)   # deltas obj 2
    ob_ref[...] = b + jnp.dot(gbt_ref[...], d, preferred_element_type=f32)


def _binary_stage(u1t, u2t, bt, params, n_unary, tm):
    f32 = jnp.float32
    NU, Mp = u1t.shape
    NB = bt.shape[0]
    g = params["G"]
    CK = g.shape[0]
    gx, gy, gbm = g[:, :n_unary], g[:, n_unary:2 * n_unary], g[:, 2 * n_unary:]
    gxt, gyt, gbt = gx.T, gy.T, gbm.T
    kern = functools.partial(_binary_ke_kernel,
                             n_clauses=params["n_clauses"], lits=params["max_lits"])
    tile = lambda t: (0, t)
    const = lambda t: (0, 0)
    return pl.pallas_call(
        kern,
        out_shape=(jax.ShapeDtypeStruct((NU, Mp), f32),
                   jax.ShapeDtypeStruct((NU, Mp), f32),
                   jax.ShapeDtypeStruct((NB, Mp), f32)),
        grid=(Mp // tm,),
        in_specs=[
            pl.BlockSpec((NU, tm), tile),                            # u[index1]^T tile
            pl.BlockSpec((NU, tm), tile),                            # u[index2]^T tile
            pl.BlockSpec((NB, tm), tile),                            # binary^T tile
            pl.BlockSpec((CK, NU), const),                           # Gx
            pl.BlockSpec((CK, NU), const),                           # Gy
            pl.BlockSpec((CK, NB), const),                           # Gb
            pl.BlockSpec((NU, CK), const),                           # Gx^T
            pl.BlockSpec((NU, CK), const),                           # Gy^T
            pl.BlockSpec((NB, CK), const),                           # Gb^T
            pl.BlockSpec((CK, 1), const),                            # literal mask
            pl.BlockSpec((CK, 1), const),                            # clause weights
            pl.BlockSpec((CK, CK), const),                           # same-clause matrix
        ],
        out_specs=[
            pl.BlockSpec((NU, tm), tile),                            # ux^T
            pl.BlockSpec((NU, tm), tile),                            # uy^T
            pl.BlockSpec((NB, tm), tile),                            # out_binary^T
        ],
        compiler_params=pltpu.CompilerParams(
            dimension_semantics=("parallel",),
            vmem_limit_bytes=_VMEM_LIMIT),
    )(u1t, u2t, bt, gx, gy, gbm, gxt, gyt, gbt,
      params["mask"], params["w"], params["seg"])


# ---------------------------------------------------------------------------
# Wrapper: RelationalKenn forward.
# ---------------------------------------------------------------------------
def relational_kenn_pallas(unary, binary, index1, index2,
                           unary_params, binary_params,
                           activation=lambda x: x, col_tile=2048):
    f32 = jnp.float32
    unary = unary.astype(f32)
    binary = binary.astype(f32)
    index1 = index1.astype(jnp.int32)
    index2 = index2.astype(jnp.int32)
    N, NU = unary.shape
    M, NB = binary.shape

    # ---- Stage 1: unary knowledge enhancement, lane-dense transposed layout ----
    ut = unary.T                                                     # [NU, N]
    if unary_params["n_clauses"] > 0:
        tn = _pick_tile(N, col_tile)
        Np = _round_up(N, tn)
        u_t = _unary_stage(jnp.pad(ut, ((0, 0), (0, Np - N))), unary_params, tn)[:, :N]
    else:
        u_t = ut
    u = u_t.T                                                        # [N, NU]

    if M == 0 or binary_params["n_clauses"] == 0:
        return activation(u), activation(binary)

    # ---- Join gather: vectorized XLA gather in the wrapper (review option b) ----
    u1_t = jnp.take(u_t, index1, axis=1)                             # [NU, M]
    u2_t = jnp.take(u_t, index2, axis=1)                             # [NU, M]
    bt = binary.T                                                    # [NB, M]

    tm = _pick_tile(M, col_tile)
    Mp = _round_up(M, tm)
    pad = ((0, 0), (0, Mp - M))

    # ---- Stage 2: binary knowledge enhancement, tiled over pairs ("parallel") ----
    ux_t, uy_t, ob_t = _binary_stage(jnp.pad(u1_t, pad), jnp.pad(u2_t, pad),
                                     jnp.pad(bt, pad), binary_params, NU, tm)
    ux = ux_t[:, :M].T                                               # [M, NU]
    uy = uy_t[:, :M].T
    out_b = ob_t[:, :M].T                                            # [M, NB]

    # ---- GroupBy: scatter-assign (torch semantics; unique-index assumption) ----
    delta_ux = jnp.zeros((N, NU), f32).at[index1].set(ux)
    delta_uy = jnp.zeros((N, NU), f32).at[index2].set(uy)
    return activation(u + delta_ux + delta_uy), activation(out_b)


# ---------------------------------------------------------------------------
# Deterministic clause-parameter construction (role of __init__ clause parsing).
# Each clause = (literal_indices, literal_signs, clause_weight).
# ---------------------------------------------------------------------------
def build_ke_params(clauses, n_predicates, max_literals):
    C, K = len(clauses), max_literals
    G = np.zeros((C * K, n_predicates), np.float32)
    mask = np.zeros((C * K, 1), np.float32)
    w = np.zeros((C * K, 1), np.float32)
    for c, (idx, signs, weight) in enumerate(clauses):
        assert len(idx) <= K
        for k, (i, s) in enumerate(zip(idx, signs)):
            G[c * K + k, i] = float(s)
            mask[c * K + k, 0] = 1.0
            w[c * K + k, 0] = float(weight)
    seg = np.kron(np.eye(C, dtype=np.float32), np.ones((K, K), np.float32))
    return dict(G=jnp.asarray(G), mask=jnp.asarray(mask), w=jnp.asarray(w),
                seg=jnp.asarray(seg), n_clauses=C, max_lits=K)


# ---------------------------------------------------------------------------
# Pure-JAX reference implementation (mirrors the PyTorch forward).
# ---------------------------------------------------------------------------
def reference_forward(unary, binary, index1, index2, clauses_u, clauses_b, NU):
    def ke(x, clauses):
        delta = jnp.zeros_like(x)
        for idx, signs, weight in clauses:
            idx = jnp.asarray(idx)
            signs = jnp.asarray(signs, jnp.float32)
            sel = x[:, idx] * signs
            sm = jax.nn.softmax(sel, axis=-1)
            d = weight * sm * signs
            delta = delta.at[:, idx].add(d)
        return delta

    u = unary + ke(unary, clauses_u)
    joined = jnp.concatenate([u[index1], u[index2], binary], axis=1)
    d = ke(joined, clauses_b)
    ux, uy, bdel = d[:, :NU], d[:, NU:2 * NU], d[:, 2 * NU:]
    dux = jnp.zeros_like(u).at[index1].set(ux)     # torch: deltas_ux[index1] = ux
    duy = jnp.zeros_like(u).at[index2].set(uy)
    return u + dux + duy, binary + bdel


if __name__ == "__main__":
    key = jax.random.PRNGKey(0)
    k1, k2, k3, k4 = jax.random.split(key, 4)

    # Small but multi-tile shapes (col_tile=128): N=256 -> 2 object tiles,
    # M=192 -> padded to 256 -> 2 pair tiles (exercises the padded tail).
    N, NU = 256, 4     # objects, unary predicates
    M, NB = 192, 3     # object pairs, binary predicates
    PJ = 2 * NU + NB   # joined predicate space

    unary = jax.random.normal(k1, (N, NU), dtype=jnp.float32)
    binary = jax.random.normal(k2, (M, NB), dtype=jnp.float32)
    # unique indices so torch scatter-assign semantics are well defined
    index1 = jax.random.permutation(k3, N)[:M].astype(jnp.int32)
    index2 = jax.random.permutation(k4, N)[:M].astype(jnp.int32)

    initial_clause_weight = 0.5
    # unary clauses over {A,B,C,D}:  nA v B ,  nC v D
    unary_clauses = [([0, 1], [-1.0, 1.0], initial_clause_weight),
                     ([2, 3], [-1.0, 1.0], initial_clause_weight)]
    # binary clauses over [A(x)..D(x), A(y)..D(y), R1..R3]:
    #   nA(x) v nR1 v A(y) ,  nB(x) v nR2 v B(y)
    binary_clauses = [([0, 8, 4], [-1.0, -1.0, 1.0], initial_clause_weight),
                      ([1, 9, 5], [-1.0, -1.0, 1.0], initial_clause_weight)]
    # implication clauses: empty (forward's else-branches produce exact zeros)

    up = build_ke_params(unary_clauses, NU, 2)
    bp = build_ke_params(binary_clauses, PJ, 3)

    out_u, out_b = relational_kenn_pallas(unary, binary, index1, index2, up, bp,
                                          col_tile=128)
    jax.block_until_ready((out_u, out_b))

    ref_u, ref_b = reference_forward(unary, binary, index1, index2,
                                     unary_clauses, binary_clauses, NU)
    np.testing.assert_allclose(np.asarray(out_u), np.asarray(ref_u), rtol=2e-3, atol=2e-3)
    np.testing.assert_allclose(np.asarray(out_b), np.asarray(ref_b), rtol=2e-3, atol=2e-3)

    print("KERNEL_OK")
</pallas_src>

<mosaic_0001>
module attributes {stable_mosaic.version = 11 : i64} {
  func.func @_unary_ke_kernel(%arg0: i32, %arg1: memref<4x128xf32, #tpu.memory_space<vmem>>, %arg2: memref<4x4xf32, #tpu.memory_space<vmem>>, %arg3: memref<4x4xf32, #tpu.memory_space<vmem>>, %arg4: memref<4x1xf32, #tpu.memory_space<vmem>>, %arg5: memref<4x1xf32, #tpu.memory_space<vmem>>, %arg6: memref<4x4xf32, #tpu.memory_space<vmem>>, %arg7: memref<4x128xf32, #tpu.memory_space<vmem>>) attributes {dimension_semantics = [#tpu.dimension_semantics<parallel>], iteration_bounds = array<i64: 2>, scalar_prefetch = 0 : i64, scratch_operands = 0 : i64, tpu.core_type = #tpu.core_type<tc>, window_params = [{transform_indices = @transform_0, window_bounds = array<i64: 4, 128>}, {pipeline_mode = #tpu.pipeline_mode<synchronous>, transform_indices = @transform_1, window_bounds = array<i64: 4, 4>}, {pipeline_mode = #tpu.pipeline_mode<synchronous>, transform_indices = @transform_2, window_bounds = array<i64: 4, 4>}, {pipeline_mode = #tpu.pipeline_mode<synchronous>, transform_indices = @transform_3, window_bounds = array<i64: 4, 1>}, {pipeline_mode = #tpu.pipeline_mode<synchronous>, transform_indices = @transform_4, window_bounds = array<i64: 4, 1>}, {pipeline_mode = #tpu.pipeline_mode<synchronous>, transform_indices = @transform_5, window_bounds = array<i64: 4, 4>}, {transform_indices = @transform_6, window_bounds = array<i64: 4, 128>}]} {
    %c0 = arith.constant 0 : index
    %c0_0 = arith.constant 0 : index
    %0 = vector.load %arg1[%c0, %c0_0] : memref<4x128xf32, #tpu.memory_space<vmem>>, vector<4x128xf32>
    %c0_1 = arith.constant 0 : index
    %c0_2 = arith.constant 0 : index
    %1 = vector.load %arg2[%c0_1, %c0_2] : memref<4x4xf32, #tpu.memory_space<vmem>>, vector<4x4xf32>
    %cst = arith.constant dense<0.000000e+00> : vector<4x128xf32>
    %2 = tpu.matmul %1, %0, %cst {dimension_numbers = #tpu.dot_dimension_numbers<[1], [0], [0], [1], [0, 0, 1, 1], [], []>} : vector<4x4xf32>, vector<4x128xf32>, vector<4x128xf32> -> vector<4x128xf32>
    %c0_3 = arith.constant 0 : index
    %c0_4 = arith.constant 0 : index
    %3 = vector.load %arg4[%c0_3, %c0_4] : memref<4x1xf32, #tpu.memory_space<vmem>>, vector<4x1xf32>
    %c0_5 = arith.constant 0 : index
    %c0_6 = arith.constant 0 : index
    %4 = vector.load %arg5[%c0_5, %c0_6] : memref<4x1xf32, #tpu.memory_space<vmem>>, vector<4x1xf32>
    %c0_7 = arith.constant 0 : index
    %c0_8 = arith.constant 0 : index
    %5 = vector.load %arg6[%c0_7, %c0_8] : memref<4x4xf32, #tpu.memory_space<vmem>>, vector<4x4xf32>
    %cst_9 = arith.constant 0.000000e+00 : f32
    %6 = vector.broadcast %cst_9 : f32 to vector<4x1xf32>
    %7 = arith.cmpf ogt, %3, %6 : vector<4x1xf32>
    %cst_10 = arith.constant -1.000000e+30 : f32
    %8 = vector.shape_cast %7 : vector<4x1xi1> to vector<4x1xi1>
    %9 = vector.broadcast %8 : vector<4x1xi1> to vector<4x128xi1>
    %10 = vector.broadcast %cst_10 : f32 to vector<4x128xf32>
    %11 = arith.select %9, %2, %10 : vector<4x128xi1>, vector<4x128xf32>
    %12 = vector.extract_strided_slice %11 {offsets = [0, 0], sizes = [2, 128], strides = [1, 1]} : vector<4x128xf32> to vector<2x128xf32>
    %cst_11 = arith.constant dense<0xFF800000> : vector<128xf32>
    %13 = vector.multi_reduction <maximumf>, %12, %cst_11 [0] : vector<2x128xf32> to vector<128xf32>
    %14 = vector.shape_cast %13 : vector<128xf32> to vector<1x128xf32>
    %15 = vector.shape_cast %14 : vector<1x128xf32> to vector<1x128xf32>
    %16 = vector.broadcast %15 : vector<1x128xf32> to vector<2x128xf32>
    %17 = vector.extract_strided_slice %11 {offsets = [2, 0], sizes = [2, 128], strides = [1, 1]} : vector<4x128xf32> to vector<2x128xf32>
    %cst_12 = arith.constant dense<0xFF800000> : vector<128xf32>
    %18 = vector.multi_reduction <maximumf>, %17, %cst_12 [0] : vector<2x128xf32> to vector<128xf32>
    %19 = vector.shape_cast %18 : vector<128xf32> to vector<1x128xf32>
    %20 = vector.shape_cast %19 : vector<1x128xf32> to vector<1x128xf32>
    %21 = vector.broadcast %20 : vector<1x128xf32> to vector<2x128xf32>
    %22 = tpu.concatenate %16, %21 in 0 : vector<2x128xf32>, vector<2x128xf32> -> vector<4x128xf32>
    %23 = arith.subf %11, %22 : vector<4x128xf32>
    %24 = math.exp %23 : vector<4x128xf32>
    %25 = vector.broadcast %3 : vector<4x1xf32> to vector<4x128xf32>
    %26 = arith.mulf %24, %25 : vector<4x128xf32>
    %cst_13 = arith.constant dense<0.000000e+00> : vector<4x128xf32>
    %27 = tpu.matmul %5, %26, %cst_13 {dimension_numbers = #tpu.dot_dimension_numbers<[1], [0], [0], [1], [0, 0, 1, 1], [], []>} : vector<4x4xf32>, vector<4x128xf32>, vector<4x128xf32> -> vector<4x128xf32>
    %cst_14 = arith.constant 1.000000e-30 : f32
    %28 = vector.broadcast %cst_14 : f32 to vector<4x128xf32>
    %29 = arith.addf %27, %28 : vector<4x128xf32>
    %30 = arith.divf %26, %29 : vector<4x128xf32>
    %31 = vector.broadcast %4 : vector<4x1xf32> to vector<4x128xf32>
    %32 = arith.mulf %30, %31 : vector<4x128xf32>
    %c0_15 = arith.constant 0 : index
    %c0_16 = arith.constant 0 : index
    %33 = vector.load %arg3[%c0_15, %c0_16] : memref<4x4xf32, #tpu.memory_space<vmem>>, vector<4x4xf32>
    %cst_17 = arith.constant dense<0.000000e+00> : vector<4x128xf32>
    %34 = tpu.matmul %33, %32, %cst_17 {dimension_numbers = #tpu.dot_dimension_numbers<[1], [0], [0], [1], [0, 0, 1, 1], [], []>} : vector<4x4xf32>, vector<4x128xf32>, vector<4x128xf32> -> vector<4x128xf32>
    %35 = arith.addf %0, %34 : vector<4x128xf32>
    %c0_18 = arith.constant 0 : index
    %c0_19 = arith.constant 0 : index
    %36 = vector.load %arg7[%c0_18, %c0_19] : memref<4x128xf32, #tpu.memory_space<vmem>>, vector<4x128xf32>
    tpu.vector_store %arg7[%c0_18, %c0_19], %35 {strides = array<i32>} : memref<4x128xf32, #tpu.memory_space<vmem>>, vector<4x128xf32>,
    return
  }
  func.func @transform_0(%arg0: i32) -> (i32, i32) {
    %c0_i32 = arith.constant 0 : i32
    %c0_i32_0 = arith.constant 0 : i32
    return %c0_i32, %arg0 : i32, i32
  }
  func.func @transform_1(%arg0: i32) -> (i32, i32) {
    %c0_i32 = arith.constant 0 : i32
    %c0_i32_0 = arith.constant 0 : i32
    %c0_i32_1 = arith.constant 0 : i32
    return %c0_i32, %c0_i32_0 : i32, i32
  }
  func.func @transform_2(%arg0: i32) -> (i32, i32) {
    %c0_i32 = arith.constant 0 : i32
    %c0_i32_0 = arith.constant 0 : i32
    %c0_i32_1 = arith.constant 0 : i32
    return %c0_i32, %c0_i32_0 : i32, i32
  }
  func.func @transform_3(%arg0: i32) -> (i32, i32) {
    %c0_i32 = arith.constant 0 : i32
    %c0_i32_0 = arith.constant 0 : i32
    %c0_i32_1 = arith.constant 0 : i32
    return %c0_i32, %c0_i32_0 : i32, i32
  }
  func.func @transform_4(%arg0: i32) -> (i32, i32) {
    %c0_i32 = arith.constant 0 : i32
    %c0_i32_0 = arith.constant 0 : i32
    %c0_i32_1 = arith.constant 0 : i32
    return %c0_i32, %c0_i32_0 : i32, i32
  }
  func.func @transform_5(%arg0: i32) -> (i32, i32) {
    %c0_i32 = arith.constant 0 : i32
    %c0_i32_0 = arith.constant 0 : i32
    %c0_i32_1 = arith.constant 0 : i32
    return %c0_i32, %c0_i32_0 : i32, i32
  }
  func.func @transform_6(%arg0: i32) -> (i32, i32) {
    %c0_i32 = arith.constant 0 : i32
    %c0_i32_0 = arith.constant 0 : i32
    return %c0_i32, %arg0 : i32, i32
  }
}

</mosaic_0001>

<bundles_post_ra>
// kernel: tpu_custom_call.1
= control target key start
LH: loop header
LB: loop body
LE: loop exit
PB: predicated region body
PF: predicated region fallthrough
CT: control target
= control target key end

     0   :  { %11 = vsyncpa [#allocation3], 0  ;;  %s913_s0 = inlined_call_operand.vmem [shape: f32[4,256], index: 0, kind: input, shape index: {}]   ;;  %s914_s1 = inlined_call_operand.vmem [shape: f32[4,4], index: 1, kind: input, shape index: {}]   ;;  %s915_s2 = inlined_call_operand.vmem [shape: f32[4,4], index: 2, kind: input, shape index: {}]   ;;  %s916_s3 = inlined_call_operand.vmem [shape: f32[4,1], index: 3, kind: input, shape index: {}]   ;;  %s917_s4 = inlined_call_operand.vmem [shape: f32[4,1], index: 4, kind: input, shape index: {}]   ;;  %s918_s5 = inlined_call_operand.vmem [shape: f32[4,4], index: 5, kind: input, shape index: {}]   ;;  %s919_s6 = inlined_call_operand.hbm [shape: f32[4,256], index: 6, kind: output, shape index: {}]  }
   0x1   :  { %13 = vsyncpa [#allocation3 + $0x1], 0  ;;  %s787_s21 = smov 0   ;;  %s789_s22 = smov 0  }
   0x2   :  { %s791_s23 = smov 0   ;;  %s793_s24 = smov 0  }
   0x3 LB: > { %s808_s25 = sadd.s32 4294967295, %s746_s24   ;;  %s599_s26 = sadd.s32 4294967294, %s746_s24   ;;  %s746_s24 = sphi %s793_s24, %s925_s24   ;;  %s742_s23 = sphi %s791_s23, %s924_s23   ;;  %s738_s22 = sphi %s789_s22, %s923_s22   ;;  %s734_s21 = sphi %s787_s21, %s922_s21  }
   0x4   : > { %s812_s27 = sadd.s32 1, %s746_s24   ;;  %s157_s28 = sadd.s32 1, %s742_s23 }
   0x5   : > { %s154_s29 = ssub.s32 %s746_s24, %s812_s27  ;;  %p167_p0 = scmp.ne.s32.totalorder %s742_s23, %s738_s22 }
   0x6   : > { %p155_p1 = scmp.eq.s32.totalorder %s154_s29, 0  ;;  %p168_p2 = scmp.eq.s32.totalorder %s808_s25, 1 }
   0x7   : > { %p173_p3 = scmp.ne.s32.totalorder %s738_s22, %s734_s21  ;;  %p174_p4 = scmp.eq.s32.totalorder %s599_s26, 1 }
   0x8   : > { %s823_s30 = scalar_select %p155_p1, %s742_s23, %s157_s28  }
   0x9   : > { %p825_p5 = por %p168_p2, %p167_p0  ;;  %p829_p6 = por %p174_p4, %p173_p3 }
   0xa   : > { %p602_p7 = scmp.ge.s32.totalorder %s746_s24, 1  ;;  %p214_p8 = scmp.lt.s32.totalorder %s746_s24, 3 }
   0xc   : > { %p215_p9 = pnand %p602_p7, %p214_p8 }
   0xd   : > { %p243_p10 = scmp.lt.s32.totalorder (!%p215_p9), %s808_s25, 1  ;;  %v748_v0 = vmov (!%p215_p9), 0.0   ;;  %vm749_vm0 = vmmov (!%p215_p9), 0   ;;  %v327_v1 = vld [vmem:[%s916_s3] sm:$0xf] (!%p215_p9)  ;;  %v750_v2 = vmov (!%p215_p9), 0  }
   0xe   : > { %218 = sbr.rel (%p215_p9) target bundleno = 730 (0x2da), region = 44  ;;  %621 = vmatprep.subr.mxu0 (!%p215_p9), %v748_v0  ;;  %623 = vmatprep.mubr.msk.f32.mxu0 (!%p215_p9), %vm749_vm0, %v748_v0  ;;  %vm330_vm1 = vcmp.gt.f32.partialorder (!%p215_p9), %v327_v1, 0.0  ;;  %vm253_vm2 = vcmask (!%p215_p9), 1043456   ;;  %v248_v4 = vld [vmem:[%s914_s1] sm:$0xf] (!%p215_p9)  ;;  %vm249_vm3 = vcmask (!%p215_p9), 31744  }
   0xf   : > { %678 = vset.pattern.permute.xlu0 (!%p215_p9), %v750_v2  ;;  %626 = vmatprep.subr.mxu1 (!%p215_p9), %v748_v0  ;;  %v331_v3 = vsel (!%p215_p9), %vm330_vm1, 1, %v750_v2  ;;  %v328_v6 = vld [vmem:[%s917_s4] sm:$0xf] (!%p215_p9)  ;;  %vm337_vm5 = vcmask (!%p215_p9), 1041408   ;;  %vm345_vm6 = vcmask (!%p215_p9), 1043458   ;;  %s240_s9 = sand.u32 (!%p215_p9), 1, %s738_s22  }
  0x10   : > { %628 = vmatprep.mubr.msk.f32.mxu1 (!%p215_p9), %vm749_vm0, %v748_v0  ;;  %679 = vset.pattern.permute.xlu1 (!%p215_p9), %v750_v2  ;;  %v329_v31 = vld [vmem:[%s918_s5] sm:$0xf] (!%p215_p9)  ;;  %s603_s10 = sshll.u32 (!%p215_p9), %s240_s9, 2  ;;  %s527_s17 = scalar_lea.sflag (!%p215_p9), [#allocation3], %s240_s9 }
  0x11   : > { %333 = vperm.xlu0 (!%p215_p9), %678, %v331_v3   ;;  %443 = vperm.xlu1 (!%p215_p9), %679, %v328_v6   ;;  %v447_v39 = vld [vmem:[%s915_s2] sm:$0xf] (!%p215_p9) }
  0x15   : > { %s244_s11 = scalar_select %p243_p10, %s808_s25, 1  ;;  %359 = vperm.xlu0 %678, %v327_v1  }
  0x17   : > { %s604_s12 = sshll.u32 %s244_s11, 2  ;;  %s612_s11 = sshll.u32 %s808_s25, 6 }
  0x18   : > { %s246_s15 = scalar_lea.vmem %s913_s0, %s604_s12  ;;  %s242_s12 = scalar_lea.vmem [#allocation2], %s603_s10 }
  0x19   : > { %v247_v5 = vld [vmem:[%s246_s15] sm:$0xf]  ;;  %s540_s13 = sshll.u32 %s242_s12, 4  ;;  %s871_s16 = scalar_lea.hbm %s919_s6, %s612_s11  ;;  %s873_s13 = int_to_ptr.vmem [resolvable:$true] %s540_s13 }
  0x1a   : > { %622 = vmatpush3.msk.msra.mxu0 %vm253_vm2, %v247_v5  ;;  %s684_s18 = scalar_lea.vmem %s873_s13, 64  ;;  %s751_s25 = smov [#allocation2]  }
  0x1b   : > { %624 = vmatmul.mubr.msk.f32.vlgmr.msra.gmra.mrb[0].mxu0 %vm249_vm3, %v248_v4  ;;  %631 = vmatprep.subr.mxu0 %v748_v0  ;;  %p685_p11 = scmp.ne.s32.totalorder %s873_s13, %s684_s18  ;;  %s688_s19 = sshll.u32 %s751_s25, 4  ;;  %s689_s19 = int_to_ptr.vmem [resolvable:$false] %s688_s19 }
  0x1c   : > { %633 = vmatprep.mubr.msk.f32.mxu0 %vm749_vm0, %v748_v0  ;;  %s690_s20 = scalar_lea.vmem %s689_s19, 128  ;;  %p691_p0 = scmp.lt.s32.totalorder %s873_s13, %s689_s19 }
  0x1d   : > { %p686_p12 = pnand %p685_p11, %p825_p5  ;;  %p692_p1 = scmp.lt.s32.totalorder %s690_s20, %s684_s18 }
  0x1f   : > { %p687_p13 = pneg %p686_p12  ;;  %p693_p2 = por %p692_p1, %p691_p0 }
  0x21   : > { %p694_p3 = pnand %p693_p2, %p687_p13 }
  0x90   : > { %v334_v7 = vpop.permute.xlu0 %333  ;;  %v444_v36 = vpop.permute.xlu1 %443 }
  0x91   : > { %vm335_vm4 = vcmp.eq.s32.totalorder %v334_v7, 1 }
  0x94   : > { %v360_v29 = vpop.permute.xlu0 %359 }
  0xee   : > { %v323_v8 = vpop.f32.mrb[0].mxu0 }
  0xef   : > { %v336_v9 = vsel %vm335_vm4, %v323_v8, -1e+30  ;;  %v625_v10 = vpop.f32.mrb[1].mxu0 }
  0xf0   : > { %v338_v11 = vsel %vm337_vm5, %v336_v9, -inf  ;;  %v346_v12 = vsel %vm345_vm6, %v336_v9, -inf }
  0xf1   : > { %v339_v13 = vrot.slane %v338_v11, 4  ;;  %v347_v14 = vrot.slane %v346_v12, 4 }
  0xf3   : > { %v340_v15 = vmax.f32 %v338_v11, %v339_v13  ;;  %v348_v16 = vmax.f32 %v346_v12, %v347_v14 }
  0xf5   : > { %v341_v17 = vrot.slane %v340_v15, 2  ;;  %v349_v18 = vrot.slane %v348_v16, 2 }
  0xf7   : > { %v342_v19 = vmax.f32 %v340_v15, %v341_v17  ;;  %v350_v20 = vmax.f32 %v348_v16, %v349_v18 }
  0xf9   : > { %v343_v21 = vrot.slane %v342_v19, 1  ;;  %v351_v22 = vrot.slane %v350_v20, 1 }
  0xfb   : > { %v344_v23 = vmax.f32 %v342_v19, %v343_v21  ;;  %v352_v24 = vmax.f32 %v350_v20, %v351_v22 }
  0xfd   : > { %v353_v25 = vsel %vm337_vm5, %v344_v23, %v352_v24 }
  0xfe   : > { %v354_v26 = vsub.f32 %v336_v9, %v353_v25 }
 0x100   : > { %v355_v27 = vmul.f32 1.442695, %v354_v26 }
 0x102   : > { %680 = vpow2.f32 %v355_v27 }
 0x10c   : > { %v681_v28 = vpop.eup %680 }
 0x10d   : > { %v362_v30 = vmul.f32 %v681_v28, %v360_v29 }
 0x10f   : > { %627 = vmatpush3.msk.msra.mxu1 %vm253_vm2, %v362_v30 }
 0x110   : > { %629 = vmatmul.mubr.msk.f32.vlgmr.msra.gmra.mrb[0].mxu1 %vm249_vm3, %v329_v31 }
 0x1e3   : > { %v435_v32 = vpop.f32.mrb[0].mxu1 }
 0x1e4   : > { %v436_v33 = vadd.f32 1e-30, %v435_v32  ;;  %v630_v34 = vpop.f32.mrb[1].mxu1 }
 0x1e6   : > { %682 = vrcp.f32 %v436_v33 }
 0x1f0   : > { %v683_v35 = vpop.eup %682 }
 0x1f1   : > { %v440_v37 = vmul.f32 %v683_v35, %v362_v30 }
 0x1f3   : > { %v446_v38 = vmul.f32 %v444_v36, %v440_v37 }
 0x1f5   : > { %632 = vmatpush3.msk.msra.mxu0 %vm253_vm2, %v446_v38 }
 0x1f6   : > { %634 = vmatmul.mubr.msk.f32.vlgmr.msra.gmra.mrb[2].mxu0 %vm249_vm3, %v447_v39 }
 0x2c9   : > { %v520_v40 = vpop.f32.mrb[2].mxu0 }
 0x2ca   : > { %v524_v41 = vadd.f32 %v520_v40, %v247_v5  ;;  %v635_v42 = vpop.f32.mrb[3].mxu0 }
 0x2cc   : > { %525 = vst [vmem:[%s242_s12] sm:$0xf] %v524_v41 }
 0x2cd   : > { %697 = shalt.err (!%p694_p3)
}
 0x2ce   : > { %s698_s26 = scalar_lea.hbm %s871_s16, 64  ;;  %s702_s9 = scalar_lea.hbm %s919_s6, 128 }
 0x2cf   : > { %p699_p4 = scmp.ne.s32.totalorder %s871_s16, %s698_s26  ;;  %p703_p9 = scmp.lt.u32.totalorder %s871_s16, %s919_s6 }
 0x2d0   : > { %p704_p10 = scmp.lt.u32.totalorder %s702_s9, %s698_s26  ;;  %p706_p12 = scmp.lt.u32.totalorder %s698_s26, %s871_s16 }
 0x2d1   : > { %p700_p7 = pnand %p699_p4, %p825_p5 }
 0x2d2   : > { %p705_p11 = por %p704_p10, %p703_p9 }
 0x2d3   : > { %p701_p8 = pneg %p700_p7 }
 0x2d4   : > { %p707_p13 = por %p706_p12, %p705_p11 }
 0x2d6   : > { %p708_p0 = pnand %p707_p13, %p701_p8 }
 0x2d8   : > { %711 = shalt.err (!%p708_p0)
}
 0x2d9   : > { %636 = dma.vmem_to_hbm [thread:$0]  (%p825_p5), %s873_s13, 64, %s871_s16, %s527_s17  }
 0x2da PF: > { %p642_p1 = scmp.ge.s32.totalorder %s746_s24, 2  ;;  %s552_s12 = sand.u32 1, %s734_s21  }
 0x2db   : > { %s553_s14 = scalar_lea.sflag [#allocation3], %s552_s12 }
 0x2dc   : > { %p639_p2 = pnand %p642_p1, %p829_p6 }
 0x2de   : > { %729 = dma.done.wait (!%p639_p2), %s553_s14, 64  }
 0x2df   : > { %731 = vsyncadd (!%p639_p2), %s553_s14, 4294967232  ;;  %p16_p3 = scmp.ge.s32.totalorder %s812_s27, 4   ;;  %s922_s21 = smov %s738_s22 }
 0x2e0   : > { %s923_s22 = smov %s742_s23  ;;  %s924_s23 = smov %s823_s30 }
 0x2e1   : > { %s925_s24 = smov %s812_s27  ;;  %18 = sbr.rel (!%p16_p3) target bundleno = 3 (0x3), region = 79 }
 0x2e8   :  { %558 = vsyncpa [#allocation3], 1 }
 0x2e9   :  { %560 = vsyncpa [#allocation3 + $0x1], 1 }

</bundles_post_ra>
